<compile_context>
chip_gen: v6e
topology: v6e:2x2x1
jax: 0.10.0
libtpu: 0.0.40
codegen_flags: <defaults>
</compile_context>

<pallas_src>
import math

import jax
import jax.numpy as jnp
from jax.experimental import pallas as pl
from jax.experimental.pallas import tpu as pltpu


# ----------------------------- kernel ----------------------------------------

def coattention_kernel(x_ref, p_ref, wxc_ref, wpc_ref, b_ref, out_ref):
    # Two MXU matmuls with f32 accumulation; bias add on the VPU in f32.
    acc = jnp.dot(x_ref[...], wxc_ref[...], preferred_element_type=jnp.float32)
    acc = acc + jnp.dot(p_ref[...], wpc_ref[...],
                        preferred_element_type=jnp.float32)
    acc = acc + b_ref[...]
    out_ref[...] = acc.astype(out_ref.dtype)


# ----------------------------- param prep (call ONCE) -------------------------

def prepare_coattention_params(params):
    """Compose the V and FC weights once (f32).  Reuse the result across calls."""
    wvx = params["W_v_x"].astype(jnp.float32)      # [drug_dim, k]
    wvp = params["W_v_p"].astype(jnp.float32)      # [protein_dim, k]
    fcx = params["fc_x"].astype(jnp.float32)       # [k, drug_dim]
    fcp = params["fc_p"].astype(jnp.float32)       # [k, protein_dim]
    drug_dim, protein_dim = wvx.shape[0], wvp.shape[0]
    d_out = drug_dim + protein_dim

    wxc = jnp.zeros((drug_dim, d_out), jnp.float32)
    wxc = wxc.at[:, :drug_dim].set(wvx @ fcx)
    wpc = jnp.zeros((protein_dim, d_out), jnp.float32)
    wpc = wpc.at[:, drug_dim:].set(wvp @ fcp)
    bias = jnp.concatenate(
        [params["b_v_x"].astype(jnp.float32) @ fcx
         + params["b_fc_x"].astype(jnp.float32),
         params["b_v_p"].astype(jnp.float32) @ fcp
         + params["b_fc_p"].astype(jnp.float32)],
        axis=1)                                    # [1, d_out]
    return {"Wxc": wxc, "Wpc": wpc, "bias": bias,
            "drug_dim": drug_dim, "protein_dim": protein_dim}


# ----------------------------- wrapper ----------------------------------------

def _round_up(n, m):
    return ((n + m - 1) // m) * m


def _round_down(n, m):
    return (n // m) * m


def _sublane(dt):
    return {4: 8, 2: 16, 1: 32}[jnp.dtype(dt).itemsize]


def coattention(x, p, packed, tile_b=None, out_dtype=None):
    """fused = concat(fc_x(V_x(x)), fc_p(V_p(p))) with pre-composed weights."""
    B, drug_dim = x.shape
    Bp, protein_dim = p.shape
    assert B == Bp
    assert drug_dim == packed["drug_dim"] and protein_dim == packed["protein_dim"]
    d_out = drug_dim + protein_dim
    out_dtype = x.dtype if out_dtype is None else jnp.dtype(out_dtype)

    sub = max(_sublane(x.dtype), _sublane(p.dtype), _sublane(out_dtype))
    if tile_b is None:
        # 2048 rows ~ 6 MiB of double-buffered tiles (lane-padded f32): fits the
        # v5e 16 MiB default scoped VMEM and leaves headroom on v7x (64 MiB).
        tile_b = 2048
        if B >= 4 * sub:                 # keep >= 2 grid steps (v7x: 2 TCs)
            tile_b = min(tile_b, _round_up(pl.cdiv(B, 2), sub))
    if B <= sub:
        tile_b = B                       # single full-array block (always legal)
    else:
        tile_b = max(sub, _round_down(min(tile_b, B), sub))
    grid = (pl.cdiv(B, tile_b),)         # ragged last tile handled by Pallas

    tiled = lambda d: pl.BlockSpec((tile_b, d), lambda i: (i, 0))
    resident = lambda shape: pl.BlockSpec(shape, lambda i: (0, 0))

    in_specs = [
        tiled(drug_dim),                  # x  (native dtype, no wrapper cast/pad)
        tiled(protein_dim),               # p
        resident((drug_dim, d_out)),      # Wxc  (VMEM-resident across the grid)
        resident((protein_dim, d_out)),   # Wpc
        resident((1, d_out)),             # folded bias
    ]
    out_specs = pl.BlockSpec((tile_b, d_out), lambda i: (i, 0))

    flops = 2 * B * (drug_dim + protein_dim) * d_out
    bytes_accessed = (
        B * drug_dim * x.dtype.itemsize
        + B * protein_dim * p.dtype.itemsize
        + (drug_dim + protein_dim + 1) * d_out * 4
        + B * d_out * jnp.dtype(out_dtype).itemsize)
    cost = pl.CostEstimate(flops=flops, transcendentals=0,
                           bytes_accessed=bytes_accessed)

    return pl.pallas_call(
        coattention_kernel,
        grid=grid,
        in_specs=in_specs,
        out_specs=out_specs,
        out_shape=jax.ShapeDtypeStruct((B, d_out), out_dtype),
        compiler_params=pltpu.CompilerParams(
            dimension_semantics=("parallel",)),
        cost_estimate=cost,
    )(x, p, packed["Wxc"], packed["Wpc"], packed["bias"])


# ---------------- deterministic parameter init (matches module shapes) --------

def xavier_normal(key, fan_in, fan_out):
    std = math.sqrt(2.0 / (fan_in + fan_out))
    # stored as [in, out] (transposed vs. nn.Linear.weight) for x @ W
    return std * jax.random.normal(key, (fan_in, fan_out), dtype=jnp.float32)


def bias_uniform(key, fan_in, fan_out):
    bound = 1.0 / math.sqrt(fan_in)
    return jax.random.uniform(key, (1, fan_out), dtype=jnp.float32,
                              minval=-bound, maxval=bound)


def init_params(key, drug_dim, protein_dim, k=64):
    layers = [
        ("q_x", drug_dim, k), ("k_p", protein_dim, k), ("v_p", protein_dim, k),
        ("q_p", protein_dim, k), ("k_x", drug_dim, k), ("v_x", drug_dim, k),
        ("fc_x", k, drug_dim), ("fc_p", k, protein_dim),
    ]
    params = {}
    keys = jax.random.split(key, 2 * len(layers))
    for i, (name, fi, fo) in enumerate(layers):
        wname = name if name.startswith("fc") else "W_" + name
        params[wname] = xavier_normal(keys[2 * i], fi, fo)
        params["b_" + name] = bias_uniform(keys[2 * i + 1], fi, fo)
    return params


# ---------------- pure-JAX reference (full path, incl. softmax) ---------------

def coattention_ref(x, p, params, k=64):
    lin = lambda a, w, b: a @ w + b
    q_x = lin(x, params["W_q_x"], params["b_q_x"])
    k_p = lin(p, params["W_k_p"], params["b_k_p"])
    v_p = lin(p, params["W_v_p"], params["b_v_p"])
    s_x = jnp.sum(q_x * k_p, axis=-1, keepdims=True) / math.sqrt(k)
    a_x = jax.nn.softmax(s_x[:, None, :], axis=-1)[:, 0, :]   # -> ones
    att_p = lin(a_x * v_p, params["fc_p"], params["b_fc_p"])

    q_p = lin(p, params["W_q_p"], params["b_q_p"])
    k_x = lin(x, params["W_k_x"], params["b_k_x"])
    v_x = lin(x, params["W_v_x"], params["b_v_x"])
    s_p = jnp.sum(q_p * k_x, axis=-1, keepdims=True) / math.sqrt(k)
    a_p = jax.nn.softmax(s_p[:, None, :], axis=-1)[:, 0, :]
    att_x = lin(a_p * v_x, params["fc_x"], params["b_fc_x"])
    return jnp.concatenate([att_x, att_p], axis=1)


if __name__ == "__main__":
    drug_dim, protein_dim, k = 32, 48, 64

    root = jax.random.PRNGKey(0)
    kparam, kx1, kp1, kx2, kp2 = jax.random.split(root, 5)
    params = init_params(kparam, drug_dim, protein_dim, k)
    packed = prepare_coattention_params(params)    # hoisted: done once

    # Case 1: small batch, single grid step.
    B = 8
    x = jax.random.normal(kx1, (B, drug_dim), dtype=jnp.float32)
    p = jax.random.normal(kp1, (B, protein_dim), dtype=jnp.float32)
    ref = coattention_ref(x, p, params, k=k)
    out = jax.block_until_ready(coattention(x, p, packed))
    assert out.shape == (B, drug_dim + protein_dim)
    assert out.dtype == jnp.float32
    assert jnp.allclose(out, ref, atol=1e-4, rtol=1e-4)

    # Case 2: ragged batch (B not a multiple of the tile) -> 2 grid steps with a
    # masked last tile; also exercise the bf16-output path (halves HBM writeback
    # on v6e/v7x, accumulation stays f32).
    B2 = 20
    x2 = jax.random.normal(kx2, (B2, drug_dim), dtype=jnp.float32)
    p2 = jax.random.normal(kp2, (B2, protein_dim), dtype=jnp.float32)
    ref2 = coattention_ref(x2, p2, params, k=k)

    out2 = jax.block_until_ready(coattention(x2, p2, packed))
    assert out2.shape == (B2, drug_dim + protein_dim)
    assert jnp.allclose(out2, ref2, atol=1e-4, rtol=1e-4)

    out2_bf16 = jax.block_until_ready(
        coattention(x2, p2, packed, out_dtype=jnp.bfloat16))
    assert out2_bf16.dtype == jnp.bfloat16
    assert jnp.allclose(out2_bf16.astype(jnp.float32), ref2,
                        atol=5e-2, rtol=5e-2)

    print("KERNEL_OK")
</pallas_src>

<mosaic_0001>
module attributes {stable_mosaic.version = 11 : i64} {
  func.func @coattention_kernel(%arg0: i32, %arg1: memref<8x32xf32, #tpu.memory_space<vmem>>, %arg2: memref<8x48xf32, #tpu.memory_space<vmem>>, %arg3: memref<32x80xf32, #tpu.memory_space<vmem>>, %arg4: memref<48x80xf32, #tpu.memory_space<vmem>>, %arg5: memref<1x80xf32, #tpu.memory_space<vmem>>, %arg6: memref<8x80xf32, #tpu.memory_space<vmem>>) attributes {dimension_semantics = [#tpu.dimension_semantics<parallel>], iteration_bounds = array<i64: 1>, scalar_prefetch = 0 : i64, scratch_operands = 0 : i64, tpu.core_type = #tpu.core_type<tc>, window_params = [{transform_indices = @transform_0, window_bounds = array<i64: 8, 32>}, {transform_indices = @transform_1, window_bounds = array<i64: 8, 48>}, {pipeline_mode = #tpu.pipeline_mode<synchronous>, transform_indices = @transform_2, window_bounds = array<i64: 32, 80>}, {pipeline_mode = #tpu.pipeline_mode<synchronous>, transform_indices = @transform_3, window_bounds = array<i64: 48, 80>}, {pipeline_mode = #tpu.pipeline_mode<synchronous>, transform_indices = @transform_4, window_bounds = array<i64: 1, 80>}, {transform_indices = @transform_5, window_bounds = array<i64: 8, 80>}]} {
    %c0 = arith.constant 0 : index
    %c0_0 = arith.constant 0 : index
    %0 = vector.load %arg1[%c0, %c0_0] : memref<8x32xf32, #tpu.memory_space<vmem>>, vector<8x32xf32>
    %c0_1 = arith.constant 0 : index
    %c0_2 = arith.constant 0 : index
    %1 = vector.load %arg3[%c0_1, %c0_2] : memref<32x80xf32, #tpu.memory_space<vmem>>, vector<32x80xf32>
    %cst = arith.constant dense<0.000000e+00> : vector<8x80xf32>
    %2 = tpu.matmul %0, %1, %cst {dimension_numbers = #tpu.dot_dimension_numbers<[1], [0], [0], [1], [0, 0, 1, 1], [], []>} : vector<8x32xf32>, vector<32x80xf32>, vector<8x80xf32> -> vector<8x80xf32>
    %c0_3 = arith.constant 0 : index
    %c0_4 = arith.constant 0 : index
    %3 = vector.load %arg2[%c0_3, %c0_4] : memref<8x48xf32, #tpu.memory_space<vmem>>, vector<8x48xf32>
    %c0_5 = arith.constant 0 : index
    %c0_6 = arith.constant 0 : index
    %4 = vector.load %arg4[%c0_5, %c0_6] : memref<48x80xf32, #tpu.memory_space<vmem>>, vector<48x80xf32>
    %cst_7 = arith.constant dense<0.000000e+00> : vector<8x80xf32>
    %5 = tpu.matmul %3, %4, %cst_7 {dimension_numbers = #tpu.dot_dimension_numbers<[1], [0], [0], [1], [0, 0, 1, 1], [], []>} : vector<8x48xf32>, vector<48x80xf32>, vector<8x80xf32> -> vector<8x80xf32>
    %6 = arith.addf %2, %5 : vector<8x80xf32>
    %c0_8 = arith.constant 0 : index
    %c0_9 = arith.constant 0 : index
    %7 = vector.load %arg5[%c0_8, %c0_9] : memref<1x80xf32, #tpu.memory_space<vmem>>, vector<1x80xf32>
    %8 = vector.broadcast %7 : vector<1x80xf32> to vector<8x80xf32>
    %9 = arith.addf %6, %8 : vector<8x80xf32>
    %c0_10 = arith.constant 0 : index
    %c0_11 = arith.constant 0 : index
    %10 = vector.load %arg6[%c0_10, %c0_11] : memref<8x80xf32, #tpu.memory_space<vmem>>, vector<8x80xf32>
    tpu.vector_store %arg6[%c0_10, %c0_11], %9 {strides = array<i32>} : memref<8x80xf32, #tpu.memory_space<vmem>>, vector<8x80xf32>,
    return
  }
  func.func @transform_0(%arg0: i32) -> (i32, i32) {
    %c0_i32 = arith.constant 0 : i32
    %c0_i32_0 = arith.constant 0 : i32
    return %arg0, %c0_i32 : i32, i32
  }
  func.func @transform_1(%arg0: i32) -> (i32, i32) {
    %c0_i32 = arith.constant 0 : i32
    %c0_i32_0 = arith.constant 0 : i32
    return %arg0, %c0_i32 : i32, i32
  }
  func.func @transform_2(%arg0: i32) -> (i32, i32) {
    %c0_i32 = arith.constant 0 : i32
    %c0_i32_0 = arith.constant 0 : i32
    %c0_i32_1 = arith.constant 0 : i32
    return %c0_i32, %c0_i32_0 : i32, i32
  }
  func.func @transform_3(%arg0: i32) -> (i32, i32) {
    %c0_i32 = arith.constant 0 : i32
    %c0_i32_0 = arith.constant 0 : i32
    %c0_i32_1 = arith.constant 0 : i32
    return %c0_i32, %c0_i32_0 : i32, i32
  }
  func.func @transform_4(%arg0: i32) -> (i32, i32) {
    %c0_i32 = arith.constant 0 : i32
    %c0_i32_0 = arith.constant 0 : i32
    %c0_i32_1 = arith.constant 0 : i32
    return %c0_i32, %c0_i32_0 : i32, i32
  }
  func.func @transform_5(%arg0: i32) -> (i32, i32) {
    %c0_i32 = arith.constant 0 : i32
    %c0_i32_0 = arith.constant 0 : i32
    return %arg0, %c0_i32 : i32, i32
  }
}

</mosaic_0001>

<bundles_post_ra>
// kernel: tpu_custom_call.1
= control target key start
LH: loop header
LB: loop body
LE: loop exit
PB: predicated region body
PF: predicated region fallthrough
CT: control target
= control target key end

     0   :  { %10 = vsyncpa [#allocation3], 0  ;;  %s474_s0 = inlined_call_operand.hbm [shape: f32[8,32], index: 0, kind: input, shape index: {}]   ;;  %s475_s1 = inlined_call_operand.hbm [shape: f32[8,48], index: 1, kind: input, shape index: {}]   ;;  %s476_s2 = inlined_call_operand.hbm [shape: f32[32,80], index: 2, kind: input, shape index: {}]   ;;  %s477_s3 = inlined_call_operand.hbm [shape: f32[48,80], index: 3, kind: input, shape index: {}]   ;;  %s478_s4 = inlined_call_operand.vmem [shape: f32[1,80], index: 4, kind: input, shape index: {}]   ;;  %s479_s5 = inlined_call_operand.hbm [shape: f32[8,80], index: 5, kind: output, shape index: {}]  }
   0x1   :  { %11 = vsyncpa [#allocation6], 0 }
   0x2   :  { %12 = vsyncpa [#allocation9], 0 }
   0x3   :  { %13 = vsyncpa [#allocation4], 0  ;;  %s417_s18 = smov [#allocation5]   ;;  %s418_s20 = smov [#allocation2]  }
   0x4   :  { %s30_s19 = sshll.u32 %s417_s18, 4  ;;  %s20_s21 = sshll.u32 %s418_s20, 4  ;;  %s31_s19 = int_to_ptr.vmem [resolvable:$true] %s30_s19  ;;  %s21_s21 = int_to_ptr.vmem [resolvable:$true] %s20_s21 }
   0x5   :  { %s317_s22 = scalar_lea.vmem %s31_s19, 128  ;;  %p322_p1 = scmp.lt.s32.totalorder %s31_s19, %s31_s19 }
   0x6   :  { %p318_p0 = scmp.ne.s32.totalorder %s31_s19, %s317_s22  ;;  %p323_p2 = scmp.lt.s32.totalorder %s317_s22, %s317_s22 }
   0x8   :  { %p324_p3 = por %p323_p2, %p322_p1 }
   0xa   :  { %p325_p4 = pnand %p324_p3, %p318_p0 }
   0xc   :  { %328 = shalt.err (!%p325_p4)
}
   0xd   :  { %33 = dma.hbm_to_vmem [thread:$0]  %s475_s1, 128, %s31_s19, [#allocation6]  }
   0xe   :  { %s337_s25 = scalar_lea.vmem %s21_s21, 128  ;;  %p342_p6 = scmp.lt.s32.totalorder %s21_s21, %s21_s21 }
   0xf   :  { %p338_p5 = scmp.ne.s32.totalorder %s21_s21, %s337_s25  ;;  %p343_p7 = scmp.lt.s32.totalorder %s337_s25, %s337_s25 }
  0x11   :  { %p344_p8 = por %p343_p7, %p342_p6 }
  0x13   :  { %p345_p9 = pnand %p344_p8, %p338_p5 }
  0x15   :  { %348 = shalt.err (!%p345_p9)
}
  0x16   :  { %23 = dma.hbm_to_vmem [thread:$0]  %s474_s0, 128, %s21_s21, [#allocation3]  }
  0x17   :  { %s419_s28 = smov [#allocation7]  }
  0x18   :  { %s39_s29 = sshll.u32 %s419_s28, 4  ;;  %s40_s29 = int_to_ptr.vmem [resolvable:$true] %s39_s29 }
  0x19   :  { %s357_s30 = scalar_lea.vmem %s40_s29, 512  ;;  %p362_p11 = scmp.lt.s32.totalorder %s40_s29, %s40_s29 }
  0x1a   :  { %p358_p10 = scmp.ne.s32.totalorder %s40_s29, %s357_s30  ;;  %p363_p12 = scmp.lt.s32.totalorder %s357_s30, %s357_s30 }
  0x1c   :  { %p364_p13 = por %p363_p12, %p362_p11 }
  0x1e   :  { %p365_p0 = pnand %p364_p13, %p358_p10 }
  0x20   :  { %368 = shalt.err (!%p365_p0)
}
  0x21   :  { %s420_s1 = smov 128   ;;  %s421_s6 = smov 8  }
  0x22   :  { %45 = dma.hbm_to_vmem [thread:$0]  %s476_s2, 512, %s40_s29, [#allocation6], %s420_s1, %s420_s1, %s421_s6  }
  0x23   :  { %s422_s9 = smov [#allocation8]  }
  0x24   :  { %s51_s10 = sshll.u32 %s422_s9, 4  ;;  %s52_s10 = int_to_ptr.vmem [resolvable:$true] %s51_s10 }
  0x25   :  { %s377_s0 = scalar_lea.vmem %s52_s10, 768  ;;  %p382_p2 = scmp.lt.s32.totalorder %s52_s10, %s52_s10 }
  0x26   :  { %p378_p1 = scmp.ne.s32.totalorder %s52_s10, %s377_s0  ;;  %p383_p3 = scmp.lt.s32.totalorder %s377_s0, %s377_s0 }
  0x28   :  { %p384_p4 = por %p383_p3, %p382_p2 }
  0x2a   :  { %p385_p5 = pnand %p384_p4, %p378_p1 }
  0x2c   :  { %388 = shalt.err (!%p385_p5)
}
  0x2d   :  { %57 = dma.hbm_to_vmem [thread:$0]  %s477_s3, 768, %s52_s10, [#allocation9], %s420_s1, %s420_s1, %s421_s6  }
  0x2e   :  { %409 = dma.done.wait [#allocation3], 128  }
  0x2f   :  { %410 = vsyncadd [#allocation3], 4294967168 }
  0x30   :  { %411 = dma.done.wait [#allocation6], 640  }
  0x31   :  { %412 = vsyncadd [#allocation6], 4294966656 }
  0x32   :  { %413 = dma.done.wait [#allocation9], 768  }
  0x33   :  { %414 = vsyncadd [#allocation9], 4294966528  ;;  %v423_v0 = vmov 0.0   ;;  %vm424_vm0 = vmmov 0   ;;  %v83_v1 = vld [vmem:[#allocation8 + $0x28] sm:$0xff]  ;;  %v82_v2 = vld [vmem:[#allocation8 + $0x20] sm:$0xff] }
  0x34   :  { %274 = vmatprep.subr.mxu0 %v423_v0  ;;  %289 = vmatprep.subr.mxu1 %v423_v0  ;;  %v76_v3 = vld [vmem:[#allocation7 + $0x18] sm:$0xff]  ;;  %v75_v4 = vld [vmem:[#allocation7 + $0x10] sm:$0xff]  ;;  %v74_v6 = vld [vmem:[#allocation7 + $0x8] sm:$0xff]  ;;  %vm158_vm1 = vcmask 261120   ;;  %vm84_vm2 = vcmask 392192   ;;  %s425_s13 = smov [#allocation10]  }
  0x35   :  { %297 = vmatprep.mubr.msk.f32.mxu1 %vm424_vm0, %v423_v0  ;;  %286 = vmatprep.mubr.msk.f32.mxu0 %vm424_vm0, %v423_v0  ;;  %v81_v5 = vld [vmem:[#allocation8 + $0x18] sm:$0xff]  ;;  %v80_v7 = vld [vmem:[#allocation8 + $0x10] sm:$0xff]  ;;  %v73_v8 = vld [vmem:[#allocation7] sm:$0xff]  ;;  %s248_s14 = sshll.u32 %s425_s13, 4  ;;  %vm240_vm3 = vcmask 654336   ;;  %s249_s14 = int_to_ptr.vmem [resolvable:$true] %s248_s14 }
  0x36   :  { %275 = vmatpush3.msra.mxu0 %v83_v1  ;;  %290 = vmatpush3.msra.mxu1 %v76_v3  ;;  %v72_v9 = vld [vmem:[#allocation2] sm:$0xff]  ;;  %v79_v10 = vld [vmem:[#allocation8 + $0x8] sm:$0xff]  ;;  %v78_v11 = vld [vmem:[#allocation8] sm:$0xff]  ;;  %s389_s15 = scalar_lea.vmem %s249_s14, 128  ;;  %p394_p7 = scmp.lt.s32.totalorder %s249_s14, %s249_s14 }
  0x37   :  { %276 = vmatprep.subr.mxu0 %v423_v0  ;;  %291 = vmatprep.subr.mxu1 %v423_v0  ;;  %v77_v12 = vld [vmem:[#allocation5] sm:$0xff]  ;;  %v261_v16 = vld [vmem:[%s478_s4] ss:$0 sm:$0xff]  ;;  %p390_p6 = scmp.ne.s32.totalorder %s249_s14, %s389_s15  ;;  %p395_p8 = scmp.lt.s32.totalorder %s389_s15, %s389_s15 }
  0x38   :  { %277 = vmatpush3.msra.mxu0 %v82_v2  ;;  %292 = vmatpush3.msra.mxu1 %v75_v4 }
  0x39   :  { %278 = vmatprep.subr.mxu0 %v423_v0  ;;  %293 = vmatprep.subr.mxu1 %v423_v0  ;;  %p396_p9 = por %p395_p8, %p394_p7 }
  0x3a   :  { %279 = vmatpush3.msra.mxu0 %v81_v5  ;;  %294 = vmatpush3.msra.mxu1 %v74_v6 }
  0x3b   :  { %280 = vmatprep.subr.mxu0 %v423_v0  ;;  %295 = vmatprep.subr.mxu1 %v423_v0  ;;  %p397_p10 = pnand %p396_p9, %p390_p6 }
  0x3c   :  { %281 = vmatpush3.msra.mxu0 %v80_v7  ;;  %296 = vmatpush3.msra.mxu1 %v73_v8 }
  0x3d   :  { %282 = vmatprep.subr.mxu0 %v423_v0  ;;  %298 = vmatmul.mubr.msk.f32.vlgmr.msra.gmra.mxu1 %vm158_vm1, %v72_v9 }
  0x3e   :  { %283 = vmatpush3.msra.mxu0 %v79_v10 }
  0x3f   :  { %284 = vmatprep.subr.mxu0 %v423_v0 }
  0x40   :  { %285 = vmatpush3.msra.mxu0 %v78_v11 }
  0x41   :  { %287 = vmatmul.mubr.msk.f32.vlgmr.msra.gmra.mxu0 %vm84_vm2, %v77_v12 }
  0xfd   :  { %v228_v13 = vpop.f32.mrf.mxu1 }
  0xff   :  { %v299_v14 = vpop.f32.mrf.mxu1 }
 0x101   :  { %v154_v15 = vpop.f32.mrf.mxu0 }
 0x102   :  { %v229_v17 = vadd.f32 %v228_v13, %v154_v15 }
 0x103   :  { %v288_v18 = vpop.f32.mrf.mxu0 }
 0x104   :  { %v239_v19 = vadd.f32 %v261_v16, %v229_v17 }
 0x106   :  { %241 = vst.msk [vmem:[#allocation10] sm:$0xff] %vm240_vm3, %v239_v19 }
 0x107   :  { %400 = shalt.err (!%p397_p10)
}
 0x108   :  { %251 = dma.vmem_to_hbm [thread:$0]  %s249_s14, 128, %s479_s5, [#allocation4]  }
 0x109   :  { %415 = dma.done.wait [#allocation4], 128  }
 0x10a   :  { %416 = vsyncadd [#allocation4], 4294967168 }
 0x10b   :  { %255 = vsyncpa [#allocation3], 1 }
 0x10c   :  { %256 = vsyncpa [#allocation6], 1 }
 0x10d   :  { %257 = vsyncpa [#allocation9], 1 }
 0x10e   :  { %258 = vsyncpa [#allocation4], 1 }

</bundles_post_ra>
